<compile_context>
chip_gen: v5e
topology: v5e:2x2
jax: 0.10.0
libtpu: 0.0.40
codegen_flags: <defaults>
</compile_context>

<pallas_src>
import jax
import jax.numpy as jnp
from jax.experimental import pallas as pl
from jax.experimental.pallas import tpu as pltpu

_LANE = 512            # lane width, multiple of 128 -> 100% lane utilization
_MAX_TILE_ROWS = 1024  # 1024 * 512 * 4B = 2 MiB per f32 tile (v7x-safe block)


def _round_up(a: int, b: int) -> int:
    return (a + b - 1) // b * b


def _relu_kernel(x_ref, o_ref):
    # Whole-tile elementwise ReLU (identity feature_alpha_dropout folded away).
    o_ref[...] = jnp.maximum(x_ref[...], jnp.zeros((), x_ref.dtype))


def _relu_slab(flat: jax.Array) -> jax.Array:
    """ReLU over a flat 1-D array via one lane-dense, row-tiled Pallas call.

    Returns a flat array of length >= flat.size (zero-padded tail; relu(0)=0).
    """
    total = flat.size
    rows = _round_up(total, _LANE) // _LANE
    # Tile rows: multiple of 8 (sublane), capped so a tile stays ~2 MiB.
    tile_rows = min(_MAX_TILE_ROWS, _round_up(rows, 8))
    rows_padded = _round_up(rows, tile_rows)
    padded_total = rows_padded * _LANE
    if padded_total != total:
        flat = jnp.pad(flat, (0, padded_total - total))
    slab = flat.reshape(rows_padded, _LANE)

    out = pl.pallas_call(
        _relu_kernel,
        out_shape=jax.ShapeDtypeStruct(slab.shape, slab.dtype),
        grid=(rows_padded // tile_rows,),
        in_specs=[pl.BlockSpec((tile_rows, _LANE), lambda i: (i, 0))],
        out_specs=pl.BlockSpec((tile_rows, _LANE), lambda i: (i, 0)),
        input_output_aliases={0: 0},
        compiler_params=pltpu.CompilerParams(
            dimension_semantics=("parallel",),   # megacore split on v7x, free elsewhere
            vmem_limit_bytes=32 * 1024 * 1024,
        ),
    )(slab)
    return out.reshape(-1)


def model_forward(x: jax.Array, y: jax.Array):
    # F.feature_alpha_dropout(..., training=False) == identity; only ReLU remains.
    nx, ny = x.size, y.size
    if x.dtype == y.dtype:
        # Fuse both tensors into ONE pallas_call via a single lane-dense slab.
        flat = jnp.concatenate([x.reshape(-1), y.reshape(-1)])
        out = _relu_slab(flat)
        return out[:nx].reshape(x.shape), out[nx:nx + ny].reshape(y.shape)
    # Fallback for mismatched dtypes: one lane-dense call per tensor.
    return (_relu_slab(x.reshape(-1))[:nx].reshape(x.shape),
            _relu_slab(y.reshape(-1))[:ny].reshape(y.shape))


if __name__ == "__main__":
    key = jax.random.PRNGKey(0)
    kx, ky = jax.random.split(key)

    # Small shapes consistent with the pnnx test (3-D and 4-D feature tensors).
    x = jax.random.normal(kx, (2, 4, 16), dtype=jnp.float32)       # [N, C, W]
    y = jax.random.normal(ky, (2, 4, 16, 16), dtype=jnp.float32)   # [N, C, H, W]

    fwd = jax.jit(model_forward)
    out_x, out_y = fwd(x, y)
    jax.block_until_ready((out_x, out_y))

    # Reference check against plain JAX (identity dropout + relu).
    ref_x = jnp.maximum(x, 0.0)
    ref_y = jnp.maximum(y, 0.0)
    assert out_x.shape == x.shape and out_y.shape == y.shape
    assert jnp.allclose(out_x, ref_x) and jnp.allclose(out_y, ref_y)

    print("KERNEL_OK")
</pallas_src>

<mosaic_0001>
module attributes {stable_mosaic.version = 11 : i64} {
  func.func @_relu_kernel(%arg0: i32, %arg1: memref<8x512xf32, #tpu.memory_space<vmem>>, %arg2: memref<8x512xf32, #tpu.memory_space<vmem>>) attributes {dimension_semantics = [#tpu.dimension_semantics<parallel>], iteration_bounds = array<i64: 1>, scalar_prefetch = 0 : i64, scratch_operands = 0 : i64, tpu.core_type = #tpu.core_type<tc>, window_params = [{transform_indices = @transform_0, window_bounds = array<i64: 8, 512>}, {transform_indices = @transform_1, window_bounds = array<i64: 8, 512>}]} {
    %c0 = arith.constant 0 : index
    %c0_0 = arith.constant 0 : index
    %0 = vector.load %arg1[%c0, %c0_0] : memref<8x512xf32, #tpu.memory_space<vmem>>, vector<8x512xf32>
    %cst = arith.constant 0.000000e+00 : f32
    %1 = vector.broadcast %cst : f32 to vector<8x512xf32>
    %2 = arith.maximumf %0, %1 : vector<8x512xf32>
    %c0_1 = arith.constant 0 : index
    %c0_2 = arith.constant 0 : index
    %3 = vector.load %arg2[%c0_1, %c0_2] : memref<8x512xf32, #tpu.memory_space<vmem>>, vector<8x512xf32>
    tpu.vector_store %arg2[%c0_1, %c0_2], %2 {strides = array<i32>} : memref<8x512xf32, #tpu.memory_space<vmem>>, vector<8x512xf32>,
    return
  }
  func.func @transform_0(%arg0: i32) -> (i32, i32) {
    %c0_i32 = arith.constant 0 : i32
    %c0_i32_0 = arith.constant 0 : i32
    return %arg0, %c0_i32 : i32, i32
  }
  func.func @transform_1(%arg0: i32) -> (i32, i32) {
    %c0_i32 = arith.constant 0 : i32
    %c0_i32_0 = arith.constant 0 : i32
    return %arg0, %c0_i32 : i32, i32
  }
}

</mosaic_0001>

<bundles_post_ra>
// kernel: model_forward.1
= control target key start
LH: loop header
LB: loop body
LE: loop exit
PB: predicated region body
PF: predicated region fallthrough
CT: control target
= control target key end

     0   :  { %s58_s0 = inlined_call_operand.vmem [shape: f32[8,512], index: 0, kind: input, shape index: {}, may-alias: {0,1}]   ;;  %s59_s1 = inlined_call_operand.vmem [shape: f32[8,512], index: 1, kind: output, shape index: {}, may-alias: {0,1}]  }
   0x1   :  { %v8_v0 = vld [vmem:[%s58_s0] sm:$0xff]  ;;  %v9_v1 = vld [vmem:[%s58_s0 + $0x8] sm:$0xff]  ;;  %v10_v2 = vld [vmem:[%s58_s0 + $0x10] sm:$0xff] }
   0x2   :  { %v12_v3 = vmax.f32 %v8_v0, 0.0  ;;  %v13_v4 = vmax.f32 %v9_v1, 0.0  ;;  %v14_v5 = vmax.f32 %v10_v2, 0.0  ;;  %v11_v6 = vld [vmem:[%s58_s0 + $0x18] sm:$0xff] }
   0x3   :  { %v15_v7 = vmax.f32 %v11_v6, 0.0 }
   0x4   :  { %16 = vst [vmem:[%s59_s1] sm:$0xff] %v12_v3 }
   0x5   :  { %17 = vst [vmem:[%s59_s1 + $0x8] sm:$0xff] %v13_v4 }
   0x6   :  { %18 = vst [vmem:[%s59_s1 + $0x10] sm:$0xff] %v14_v5 }
   0x7   :  { %19 = vst [vmem:[%s59_s1 + $0x18] sm:$0xff] %v15_v7 }

</bundles_post_ra>
